<compile_context>
chip_gen: v7x
topology: tpu7x:2x2x1
jax: 0.10.0
libtpu: 0.0.40
codegen_flags: <defaults>
</compile_context>

<pallas_src>
import functools

import jax
import jax.numpy as jnp
from jax.experimental import pallas as pl
from jax.experimental.pallas import tpu as pltpu

NUM_CLASSES = 12
SMOOTHING = 0.1


def _ls_loss_kernel(x_ref, t_ref, out_ref, acc_ref, *, hw, inv_total, a, b):
    i = pl.program_id(0)

    @pl.when(i == 0)
    def _():
        acc_ref[...] = jnp.zeros_like(acc_ref)

    x = x_ref[...].astype(jnp.float32)          # (N, C, T) logits (f32 or upcast bf16)
    t = t_ref[...]                              # (N, T)    int32 labels
    n, c, tile = x.shape

    # --- log-softmax pieces over the class axis (axis=1) ---
    m = jnp.max(x, axis=1, keepdims=True)       # (N, 1, T)
    z = x - m                                   # (N, C, T)
    lse = jnp.log(jnp.sum(jnp.exp(z), axis=1))  # (N, T)
    sum_z = jnp.sum(z, axis=1)                  # (N, T)

    # z at the target class, via class-axis iota + select (no extra one-hot multiply pass)
    cls = jax.lax.broadcasted_iota(jnp.int32, (n, c, tile), 1)
    z_t = jnp.sum(jnp.where(cls == t[:, None, :], z, 0.0), axis=1)   # (N, T)

    # per-pixel label-smoothing loss (coefficient of lse is exactly 1.0)
    loss = lse - a * z_t - b * sum_z            # (N, T)

    # mask padded spatial positions (spatial axis was padded to a multiple of the tile)
    pos = i * tile + jax.lax.broadcasted_iota(jnp.int32, (n, tile), 1)
    loss = jnp.where(pos < hw, loss, 0.0)

    # per-lane partial sums: plain VPU adds every step; single XLU reduce in the epilogue
    acc_ref[...] += loss

    @pl.when(i == pl.num_programs(0) - 1)
    def _():
        out_ref[...] = jnp.reshape(jnp.sum(acc_ref[...]) * inv_total, (1, 1))


def _round_up(x, m):
    return ((x + m - 1) // m) * m


def _pick_tile(hw, n, c, itemsize):
    """Largest 128-multiple lane tile that keeps double-buffered inputs + acc small."""
    budget = 8 * 1024 * 1024  # conservative; fits default scoped VMEM on v5e/v6e/v7x
    per_lane_bytes = 2 * (n * c * itemsize + n * 4) + n * 4  # 2x-buffered x,t + f32 acc
    max_tile = max(128, (budget // per_lane_bytes) // 128 * 128)
    return min(_round_up(hw, 128), max_tile, 16384)


def label_smoothing_loss(pred, target, classes=NUM_CLASSES, smoothing=SMOOTHING):
    """pred: (N, C, *spatial) float; target: (N, *spatial) int in [0, C)."""
    n, c = pred.shape[0], pred.shape[1]
    assert c == classes
    hw = 1
    for d in pred.shape[2:]:
        hw *= d

    x = pred.reshape(n, c, hw)                      # keep producer dtype (f32 or bf16)
    t = target.reshape(n, hw).astype(jnp.int32)

    itemsize = jnp.dtype(x.dtype).itemsize
    tile = _pick_tile(hw, n, c, itemsize)
    hw_pad = _round_up(hw, tile)
    if hw_pad != hw:
        x = jnp.pad(x, ((0, 0), (0, 0), (0, hw_pad - hw)))
        t = jnp.pad(t, ((0, 0), (0, hw_pad - hw)))
    grid = (hw_pad // tile,)

    confidence = 1.0 - smoothing
    smooth_val = smoothing / (c - 1)
    kernel = functools.partial(
        _ls_loss_kernel,
        hw=hw,
        inv_total=1.0 / float(n * hw),
        a=float(confidence - smooth_val),
        b=float(smooth_val),
    )

    cost = pl.CostEstimate(
        flops=int(12 * n * c * hw),
        transcendentals=int(n * c * hw + n * hw),
        bytes_accessed=int(n * c * hw * itemsize + n * hw * 4 + 4),
    )

    out = pl.pallas_call(
        kernel,
        out_shape=jax.ShapeDtypeStruct((1, 1), jnp.float32),
        grid_spec=pltpu.PrefetchScalarGridSpec(
            num_scalar_prefetch=0,
            grid=grid,
            in_specs=[
                pl.BlockSpec((n, c, tile), lambda i: (0, 0, i)),   # logits tile
                pl.BlockSpec((n, tile), lambda i: (0, i)),         # labels tile
            ],
            out_specs=pl.BlockSpec((1, 1), lambda i: (0, 0)),
            scratch_shapes=[
                pltpu.VMEM((n, tile), jnp.float32),                # per-lane loss accumulator
            ],
        ),
        compiler_params=pltpu.CompilerParams(
            dimension_semantics=("arbitrary",),
            vmem_limit_bytes=32 * 1024 * 1024,
        ),
        cost_estimate=cost,
    )(x, t)
    # TODO(synk): on v7x a leading "parallel" grid axis (2 TCs) with per-core partials
    # would roughly halve the serial tile loop; kept single-axis for portability.
    return out[0, 0]


def _reference_loss(pred, target, classes=NUM_CLASSES, smoothing=SMOOTHING):
    """Pure-JAX mirror of the PyTorch LabelSmoothingLoss forward."""
    c = pred.shape[1]
    logp = jax.nn.log_softmax(pred.astype(jnp.float32), axis=1)
    onehot = jax.nn.one_hot(target, c, axis=1, dtype=jnp.float32)
    true_dist = (smoothing / (c - 1)) * (1.0 - onehot) + (1.0 - smoothing) * onehot
    return jnp.mean(jnp.sum(-true_dist * logp, axis=1))


if __name__ == "__main__":
    key = jax.random.PRNGKey(0)
    k1, k2, k3, k4 = jax.random.split(key, 4)

    # Case 1: lane-aligned spatial extent.
    N, C, H, W = 2, NUM_CLASSES, 16, 16
    logits = jax.random.normal(k1, (N, C, H, W), dtype=jnp.float32)
    target = jax.random.randint(k2, (N, H, W), 0, C, dtype=jnp.int32)
    loss = label_smoothing_loss(logits, target)
    jax.block_until_ready(loss)
    ref = _reference_loss(logits, target)
    assert jnp.allclose(loss, ref, rtol=1e-5, atol=1e-6), (loss, ref)

    # Case 2: non-128-divisible spatial extent (exercises padding + in-kernel masking).
    H2, W2 = 10, 13
    logits2 = jax.random.normal(k3, (N, C, H2, W2), dtype=jnp.float32)
    target2 = jax.random.randint(k4, (N, H2, W2), 0, C, dtype=jnp.int32)
    loss2 = label_smoothing_loss(logits2, target2)
    jax.block_until_ready(loss2)
    ref2 = _reference_loss(logits2, target2)
    assert jnp.allclose(loss2, ref2, rtol=1e-5, atol=1e-6), (loss2, ref2)

    print("KERNEL_OK")
</pallas_src>

<mosaic_0001>
module attributes {stable_mosaic.version = 11 : i64} {
  func.func @_ls_loss_kernel(%arg0: i32, %arg1: memref<2x12x256xf32, #tpu.memory_space<vmem>>, %arg2: memref<2x256xi32, #tpu.memory_space<vmem>>, %arg3: memref<1x1xf32, #tpu.memory_space<vmem>>, %arg4: memref<2x256xf32, #tpu.memory_space<vmem>>) attributes {dimension_semantics = [#tpu.dimension_semantics<arbitrary>], iteration_bounds = array<i64: 1>, scalar_prefetch = 0 : i64, scratch_operands = 1 : i64, tpu.core_type = #tpu.core_type<tc>, window_params = [{transform_indices = @transform_0, window_bounds = array<i64: 2, 12, 256>}, {transform_indices = @transform_1, window_bounds = array<i64: 2, 256>}, {pipeline_mode = #tpu.pipeline_mode<synchronous>, transform_indices = @transform_2, window_bounds = array<i64: 1, 1>}]} {
    %c0_i32 = arith.constant 0 : i32
    %0 = arith.cmpi eq, %arg0, %c0_i32 : i32
    %1 = arith.extui %0 : i1 to i32
    %c0_i32_0 = arith.constant 0 : i32
    %2 = arith.cmpi ne, %1, %c0_i32_0 : i32
    scf.if %2 {
      %cst_19 = arith.constant 0.000000e+00 : f32
      %40 = vector.broadcast %cst_19 : f32 to vector<2x256xf32>
      %c0_20 = arith.constant 0 : index
      %c0_21 = arith.constant 0 : index
      %41 = vector.load %arg4[%c0_20, %c0_21] : memref<2x256xf32, #tpu.memory_space<vmem>>, vector<2x256xf32>
      tpu.vector_store %arg4[%c0_20, %c0_21], %40 {strides = array<i32>} : memref<2x256xf32, #tpu.memory_space<vmem>>, vector<2x256xf32>,
    } else {
    }
    %c0 = arith.constant 0 : index
    %c0_1 = arith.constant 0 : index
    %c0_2 = arith.constant 0 : index
    %3 = vector.load %arg1[%c0, %c0_1, %c0_2] : memref<2x12x256xf32, #tpu.memory_space<vmem>>, vector<2x12x256xf32>
    %c0_3 = arith.constant 0 : index
    %c0_4 = arith.constant 0 : index
    %4 = vector.load %arg2[%c0_3, %c0_4] : memref<2x256xi32, #tpu.memory_space<vmem>>, vector<2x256xi32>
    %cst = arith.constant dense<0xFF800000> : vector<2x256xf32>
    %5 = vector.multi_reduction <maximumf>, %3, %cst [1] : vector<2x12x256xf32> to vector<2x256xf32>
    %6 = vector.shape_cast %5 : vector<2x256xf32> to vector<2x1x256xf32>
    %7 = vector.broadcast %6 : vector<2x1x256xf32> to vector<2x12x256xf32>
    %8 = arith.subf %3, %7 : vector<2x12x256xf32>
    %9 = math.exp %8 : vector<2x12x256xf32>
    %cst_5 = arith.constant dense<0.000000e+00> : vector<2x256xf32>
    %10 = vector.multi_reduction <add>, %9, %cst_5 [1] : vector<2x12x256xf32> to vector<2x256xf32>
    %11 = math.log %10 : vector<2x256xf32>
    %cst_6 = arith.constant dense<0.000000e+00> : vector<2x256xf32>
    %12 = vector.multi_reduction <add>, %8, %cst_6 [1] : vector<2x12x256xf32> to vector<2x256xf32>
    %13 = tpu.iota {dimensions = array<i32: 1>} : vector<2x12x256xi32>
    %14 = vector.shape_cast %4 : vector<2x256xi32> to vector<2x1x256xi32>
    %15 = vector.broadcast %14 : vector<2x1x256xi32> to vector<2x12x256xi32>
    %16 = arith.cmpi eq, %13, %15 : vector<2x12x256xi32>
    %cst_7 = arith.constant 0.000000e+00 : f32
    %17 = vector.broadcast %cst_7 : f32 to vector<2x12x256xf32>
    %18 = arith.select %16, %8, %17 : vector<2x12x256xi1>, vector<2x12x256xf32>
    %cst_8 = arith.constant dense<0.000000e+00> : vector<2x256xf32>
    %19 = vector.multi_reduction <add>, %18, %cst_8 [1] : vector<2x12x256xf32> to vector<2x256xf32>
    %cst_9 = arith.constant 0.890909075 : f32
    %20 = vector.broadcast %cst_9 : f32 to vector<2x256xf32>
    %21 = arith.mulf %20, %19 : vector<2x256xf32>
    %22 = arith.subf %11, %21 : vector<2x256xf32>
    %cst_10 = arith.constant 0.0090909088 : f32
    %23 = vector.broadcast %cst_10 : f32 to vector<2x256xf32>
    %24 = arith.mulf %23, %12 : vector<2x256xf32>
    %25 = arith.subf %22, %24 : vector<2x256xf32>
    %c256_i32 = arith.constant 256 : i32
    %26 = arith.muli %arg0, %c256_i32 : i32
    %27 = tpu.iota {dimensions = array<i32: 1>} : vector<2x256xi32>
    %28 = vector.broadcast %26 : i32 to vector<2x256xi32>
    %29 = arith.addi %28, %27 : vector<2x256xi32>
    %c256_i32_11 = arith.constant 256 : i32
    %30 = vector.broadcast %c256_i32_11 : i32 to vector<2x256xi32>
    %31 = arith.cmpi slt, %29, %30 : vector<2x256xi32>
    %cst_12 = arith.constant 0.000000e+00 : f32
    %32 = vector.broadcast %cst_12 : f32 to vector<2x256xf32>
    %33 = arith.select %31, %25, %32 : vector<2x256xi1>, vector<2x256xf32>
    %c0_13 = arith.constant 0 : index
    %c0_14 = arith.constant 0 : index
    %34 = vector.load %arg4[%c0_13, %c0_14] : memref<2x256xf32, #tpu.memory_space<vmem>>, vector<2x256xf32>
    %35 = arith.addf %34, %33 : vector<2x256xf32>
    %c0_15 = arith.constant 0 : index
    %c0_16 = arith.constant 0 : index
    %36 = vector.load %arg4[%c0_15, %c0_16] : memref<2x256xf32, #tpu.memory_space<vmem>>, vector<2x256xf32>
    tpu.vector_store %arg4[%c0_15, %c0_16], %35 {strides = array<i32>} : memref<2x256xf32, #tpu.memory_space<vmem>>, vector<2x256xf32>,
    %c0_i32_17 = arith.constant 0 : i32
    %37 = arith.cmpi eq, %arg0, %c0_i32_17 : i32
    %38 = arith.extui %37 : i1 to i32
    %c0_i32_18 = arith.constant 0 : i32
    %39 = arith.cmpi ne, %38, %c0_i32_18 : i32
    scf.if %39 {
      %c0_19 = arith.constant 0 : index
      %c0_20 = arith.constant 0 : index
      %40 = vector.load %arg4[%c0_19, %c0_20] : memref<2x256xf32, #tpu.memory_space<vmem>>, vector<2x256xf32>
      %41 = vector.shape_cast %40 : vector<2x256xf32> to vector<1x2x256xf32>
      %cst_21 = arith.constant dense<0.000000e+00> : vector<1xf32>
      %42 = vector.multi_reduction <add>, %41, %cst_21 [1, 2] : vector<1x2x256xf32> to vector<1xf32>
      %43 = vector.shape_cast %42 : vector<1xf32> to vector<1x1x1xf32>
      %44 = vector.extract %43[0, 0, 0] : f32 from vector<1x1x1xf32>
      %cst_22 = arith.constant 0.001953125 : f32
      %45 = arith.mulf %44, %cst_22 : f32
      %46 = vector.broadcast %45 : f32 to vector<1x1xf32>
      %c0_23 = arith.constant 0 : index
      %c0_24 = arith.constant 0 : index
      %47 = vector.load %arg3[%c0_23, %c0_24] : memref<1x1xf32, #tpu.memory_space<vmem>>, vector<1x1xf32>
      tpu.vector_store %arg3[%c0_23, %c0_24], %46 {strides = array<i32>} : memref<1x1xf32, #tpu.memory_space<vmem>>, vector<1x1xf32>,
    } else {
    }
    return
  }
  func.func @transform_0(%arg0: i32) -> (i32, i32, i32) {
    %c0_i32 = arith.constant 0 : i32
    %c0_i32_0 = arith.constant 0 : i32
    %c0_i32_1 = arith.constant 0 : i32
    return %c0_i32, %c0_i32_0, %arg0 : i32, i32, i32
  }
  func.func @transform_1(%arg0: i32) -> (i32, i32) {
    %c0_i32 = arith.constant 0 : i32
    %c0_i32_0 = arith.constant 0 : i32
    return %c0_i32, %arg0 : i32, i32
  }
  func.func @transform_2(%arg0: i32) -> (i32, i32) {
    %c0_i32 = arith.constant 0 : i32
    %c0_i32_0 = arith.constant 0 : i32
    %c0_i32_1 = arith.constant 0 : i32
    return %c0_i32, %c0_i32_0 : i32, i32
  }
}

</mosaic_0001>

<bundles_post_ra>
// kernel: tpu_custom_call.1
= control target key start
LH: loop header
LB: loop body
LE: loop exit
PB: predicated region body
PF: predicated region fallthrough
CT: control target
= control target key end

     0   :  { %vm26_vm0 = vcmask 1043456   ;;  %v381_v3 = vmov 0.0   ;;  %s470_s0 = inlined_call_operand.vmem [shape: f32[2,12,256], index: 0, kind: input, shape index: {}]   ;;  %s471_s1 = inlined_call_operand.vmem [shape: s32[2,256], index: 1, kind: input, shape index: {}]   ;;  %s472_s2 = inlined_call_operand.hbm [shape: f32[1,1], index: 2, kind: output, shape index: {}]  }
   0x1   :  { %v17_v0 = vld [vmem:[%s470_s0] sm:$0xff]  ;;  %v18_v1 = vld [vmem:[%s470_s0 + $0x8] sm:$0xff]  ;;  %v19_v2 = vld [vmem:[%s470_s0 + $0x10] sm:$0xf]  ;;  %16 = vst [vmem:[#allocation2] sm:$0xf] %v381_v3 }
   0x2   :  { %v20_v4 = vld [vmem:[%s470_s0 + $0x18] sm:$0xf]  ;;  %v21_v5 = vld [vmem:[%s470_s0 + $0x20] sm:$0xff]  ;;  %v22_v6 = vld [vmem:[%s470_s0 + $0x28] sm:$0xff]  ;;  %v27_v7 = vsel %vm26_vm0, %v19_v2, -inf }
   0x3   :  { %v23_v8 = vld [vmem:[%s470_s0 + $0x30] sm:$0xf]  ;;  %v24_v9 = vld [vmem:[%s470_s0 + $0x38] sm:$0xf]  ;;  %v28_v10 = vmax.f32 %v17_v0, %v27_v7  ;;  %v35_v11 = vsel %vm26_vm0, %v20_v4, -inf }
   0x4   :  { %v36_v12 = vmax.f32 %v18_v1, %v35_v11  ;;  %v43_v13 = vsel %vm26_vm0, %v23_v8, -inf  ;;  %v51_v14 = vsel %vm26_vm0, %v24_v9, -inf }
   0x5   :  { %v29_v15 = vrot.slane %v28_v10, 4  ;;  %v44_v16 = vmax.f32 %v21_v5, %v43_v13  ;;  %v52_v17 = vmax.f32 %v22_v6, %v51_v14 }
   0x6   :  { %7 = vsyncpa [#allocation4], 0  ;;  %v37_v18 = vrot.slane %v36_v12, 4  ;;  %v155_v23 = vlaneseq  ;;  %vm259_vm9 = vcmask 1041409   ;;  %vm295_vm10 = vcmask 1041408  }
   0x7   :  { %v30_v19 = vmax.f32 %v28_v10, %v29_v15  ;;  %v45_v20 = vrot.slane %v44_v16, 4  ;;  %v53_v21 = vrot.slane %v52_v17, 4  ;;  %v326_v40 = vld.sshfl [vmem:[%s471_s1] sm:$0x33 pattern:$0x75316420] }
   0x8   :  { %v38_v22 = vmax.f32 %v36_v12, %v37_v18  ;;  %v427_v32 = vshrl.u32 %v155_v23, 7  ;;  %v165_v52 = vcombine.high %v326_v40, %v326_v40  ;;  %s383_s1 = smov [#allocation3]   ;;  %vm310_vm11 = vcmask 0  }
   0x9   :  { %v31_v24 = vrot.slane %v30_v19, 2  ;;  %v46_v25 = vmax.f32 %v44_v16, %v45_v20  ;;  %v54_v26 = vmax.f32 %v52_v17, %v53_v21  ;;  %s318_s26 = sshll.u32 %s383_s1, 4  ;;  %s319_s26 = int_to_ptr.vmem [resolvable:$true] %s318_s26 }
   0xa   :  { %v39_v27 = vrot.slane %v38_v22, 2  ;;  %v168_v42 = vsub.s32 0, %v427_v32  ;;  %v172_v49 = vsub.s32 1, %v427_v32  ;;  %v157_v59 = vadd.s32 8, %v427_v32  ;;  %s357_s29 = scalar_lea.vmem %s319_s26, 16  ;;  %s361_s30 = scalar_lea.vmem %s319_s26, 32 }
   0xb   :  { %v32_v28 = vmax.f32 %v30_v19, %v31_v24  ;;  %v47_v29 = vrot.slane %v46_v25, 2  ;;  %v55_v30 = vrot.slane %v54_v26, 2  ;;  %p358_p0 = scmp.ne.s32.totalorder %s319_s26, %s357_s29  ;;  %p362_p1 = scmp.lt.s32.totalorder %s319_s26, %s319_s26 }
   0xc   :  { %v40_v31 = vmax.f32 %v38_v22, %v39_v27  ;;  %v169_v60 = vrot.slane %v326_v40, %v168_v42  ;;  %v173_v62 = vrot.slane %v326_v40, %v172_v49  ;;  %p363_p2 = scmp.lt.s32.totalorder %s361_s30, %s357_s29 }
   0xd   :  { %v33_v33 = vrot.slane %v32_v28, 1  ;;  %v48_v34 = vmax.f32 %v46_v25, %v47_v29  ;;  %v56_v35 = vmax.f32 %v54_v26, %v55_v30 }
   0xe   :  { %v41_v36 = vrot.slane %v40_v31, 1  ;;  %vm184_vm1 = vcmp.eq.s32.totalorder %v157_v59, %v169_v60  ;;  %vm182_vm2 = vcmp.eq.s32.totalorder %v427_v32, %v169_v60  ;;  %vm185_vm3 = vcmp.eq.s32.totalorder %v157_v59, %v173_v62  ;;  %p364_p3 = por %p363_p2, %p362_p1 }
   0xf   :  { %v34_v37 = vmax.f32 %v32_v28, %v33_v33  ;;  %v49_v38 = vrot.slane %v48_v34, 1  ;;  %v57_v39 = vrot.slane %v56_v35, 1  ;;  %vm183_vm4 = vcmp.eq.s32.totalorder %v427_v32, %v173_v62 }
  0x10   :  { %v42_v41 = vmax.f32 %v40_v31, %v41_v36  ;;  %p365_p4 = pnand %p364_p3, %p358_p0 }
  0x11   :  { %v50_v43 = vmax.f32 %v48_v34, %v49_v38  ;;  %v58_v44 = vmax.f32 %v56_v35, %v57_v39  ;;  %v59_v45 = vsub.f32 %v17_v0, %v34_v37  ;;  %v61_v46 = vsub.f32 %v19_v2, %v34_v37 }
  0x12   :  { %v60_v47 = vsub.f32 %v18_v1, %v42_v41  ;;  %v62_v48 = vsub.f32 %v20_v4, %v42_v41  ;;  %v177_v0 = vrot.slane %v165_v52, %v168_v42  ;;  %v181_v4 = vrot.slane %v165_v52, %v172_v49 }
  0x13   :  { %v63_v50 = vsub.f32 %v21_v5, %v50_v43  ;;  %v434_v51 = vsub.f32 %v22_v6, %v58_v44  ;;  %v65_v53 = vsub.f32 %v23_v8, %v50_v43  ;;  %v67_v54 = vmul.f32 1.442695, %v59_v45 }
  0x14   :  { %v69_v55 = vmul.f32 1.442695, %v60_v47  ;;  %v71_v56 = vmul.f32 1.442695, %v61_v46  ;;  %v66_v57 = vsub.f32 %v24_v9, %v58_v44  ;;  %v73_v58 = vmul.f32 1.442695, %v62_v48 }
  0x15   :  { %333 = vpow2.f32 %v67_v54  ;;  %v75_v61 = vmul.f32 1.442695, %v63_v50  ;;  %v77_v63 = vmul.f32 1.442695, %v434_v51  ;;  %v79_v1 = vmul.f32 1.442695, %v65_v53 }
  0x16   :  { %335 = vpow2.f32 %v69_v55  ;;  %v81_v2 = vmul.f32 1.442695, %v66_v57  ;;  %v123_v3 = vsel %vm26_vm0, %v61_v46, 0.0  ;;  %vm188_vm5 = vcmp.eq.s32.totalorder %v157_v59, %v177_v0 }
  0x17   :  { %337 = vpow2.f32 %v71_v56  ;;  %vm186_vm6 = vcmp.eq.s32.totalorder %v427_v32, %v177_v0  ;;  %v192_v5 = vsel %vm184_vm1, %v61_v46, 0.0  ;;  %v124_v6 = vadd.f32 %v123_v3, %v59_v45 }
  0x18   :  { %339 = vpow2.f32 %v73_v58  ;;  %v190_v7 = vsel %vm182_vm2, %v59_v45, 0.0  ;;  %v193_v8 = vsel %vm185_vm3, %v62_v48, 0.0  ;;  %v131_v9 = vsel %vm26_vm0, %v62_v48, 0.0 }
  0x19   :  { %341 = vpow2.f32 %v75_v61  ;;  %v139_v10 = vsel %vm26_vm0, %v65_v53, 0.0  ;;  %v191_v11 = vsel %vm183_vm4, %v60_v47, 0.0  ;;  %v196_v12 = vsel %vm188_vm5, %v65_v53, 0.0 }
  0x1a   :  { %343 = vpow2.f32 %v77_v63  ;;  %v198_v13 = vsel %vm26_vm0, %v192_v5, 0.0  ;;  %vm189_vm7 = vcmp.eq.s32.totalorder %v157_v59, %v181_v4  ;;  %v194_v15 = vsel %vm186_vm6, %v63_v50, 0.0 }
  0x1b   :  { %345 = vpow2.f32 %v79_v1  ;;  %v199_v16 = vadd.f32 %v198_v13, %v190_v7  ;;  %v206_v17 = vsel %vm26_vm0, %v193_v8, 0.0  ;;  %v132_v19 = vadd.f32 %v131_v9, %v60_v47 }
  0x1c   :  { %347 = vpow2.f32 %v81_v2  ;;  %v140_v20 = vadd.f32 %v139_v10, %v63_v50  ;;  %v207_v21 = vadd.f32 %v206_v17, %v191_v11  ;;  %v214_v22 = vsel %vm26_vm0, %v196_v12, 0.0 }
  0x1d   :  { %v125_v24 = vrot.slane %v124_v6, 4  ;;  %v147_v25 = vsel %vm26_vm0, %v66_v57, 0.0  ;;  %v200_v26 = vrot.slane %v199_v16, 4  ;;  %vm187_vm8 = vcmp.eq.s32.totalorder %v427_v32, %v181_v4 }
  0x1e   :  { %v215_v29 = vadd.f32 %v214_v22, %v194_v15  ;;  %v197_v34 = vsel %vm189_vm7, %v66_v57, 0.0  ;;  %v208_v35 = vrot.slane %v207_v21, 4  ;;  %v133_v38 = vrot.slane %v132_v19, 4 }
  0x1f   :  { %v334_v14 = vpop.eup %333  ;;  %v141_v39 = vrot.slane %v140_v20, 4  ;;  %v148_v40 = vadd.f32 %v147_v25, %v434_v51  ;;  %v126_v43 = vadd.f32 %v125_v24, %v124_v6  ;;  %v195_v44 = vsel %vm187_vm8, %v434_v51, 0.0 }
  0x20   :  { %v336_v18 = vpop.eup %335  ;;  %v201_v45 = vadd.f32 %v200_v26, %v199_v16  ;;  %v216_v49 = vrot.slane %v215_v29, 4  ;;  %v222_v50 = vsel %vm26_vm0, %v197_v34, 0.0  ;;  %v209_v55 = vadd.f32 %v208_v35, %v207_v21 }
  0x21   :  { %v338_v23 = vpop.eup %337  ;;  %v134_v58 = vadd.f32 %v133_v38, %v132_v19  ;;  %v149_v59 = vrot.slane %v148_v40, 4  ;;  %v142_v51 = vadd.f32 %v141_v39, %v140_v20  ;;  %v223_v62 = vadd.f32 %v222_v50, %v195_v44 }
  0x22   :  { %v340_v27 = vpop.eup %339  ;;  %v83_v28 = vsel %vm26_vm0, %v338_v23, 0.0  ;;  %v202_v1 = vrot.slane %v201_v45, 2  ;;  %v217_v2 = vadd.f32 %v216_v49, %v215_v29  ;;  %v210_v5 = vrot.slane %v209_v55, 2 }
  0x23   :  { %v342_v30 = vpop.eup %341  ;;  %v84_v31 = vadd.f32 %v334_v14, %v83_v28  ;;  %v91_v33 = vsel %vm26_vm0, %v340_v27, 0.0  ;;  %v224_v6 = vrot.slane %v223_v62, 4  ;;  %v127_v9 = vrot.slane %v126_v43, 2 }
  0x24   :  { %v344_v36 = vpop.eup %343  ;;  %v92_v37 = vadd.f32 %v336_v18, %v91_v33  ;;  %v150_v10 = vadd.f32 %v149_v59, %v148_v40  ;;  %v135_v13 = vrot.slane %v134_v58, 2  ;;  %v203_v17 = vadd.f32 %v202_v1, %v201_v45 }
  0x25   :  { %v346_v41 = vpop.eup %345  ;;  %v85_v42 = vrot.slane %v84_v31, 4  ;;  %v225_v14 = vadd.f32 %v224_v6, %v223_v62  ;;  %v218_v18 = vrot.slane %v217_v2, 2  ;;  %v211_v21 = vadd.f32 %v210_v5, %v209_v55 }
  0x26   :  { %v348_v46 = vpop.eup %347  ;;  %v93_v47 = vrot.slane %v92_v37, 4  ;;  %v99_v48 = vsel %vm26_vm0, %v346_v41, 0.0  ;;  %v143_v25 = vrot.slane %v142_v51, 2  ;;  %v128_v27 = vadd.f32 %v127_v9, %v126_v43 }
  0x27   :  { %v86_v52 = vadd.f32 %v85_v42, %v84_v31  ;;  %v100_v53 = vadd.f32 %v342_v30, %v99_v48  ;;  %v107_v54 = vsel %vm26_vm0, %v348_v46, 0.0  ;;  %v226_v22 = vrot.slane %v225_v14, 2 }
  0x28   :  { %v94_v56 = vadd.f32 %v93_v47, %v92_v37  ;;  %v108_v57 = vadd.f32 %v344_v36, %v107_v54  ;;  %v151_v28 = vrot.slane %v150_v10, 2  ;;  %v204_v30 = vrot.slane %v203_v17, 1 }
  0x29   :  { %v87_v60 = vrot.slane %v86_v52, 2  ;;  %v101_v61 = vrot.slane %v100_v53, 4  ;;  %v219_v31 = vadd.f32 %v218_v18, %v217_v2  ;;  %v136_v34 = vadd.f32 %v135_v13, %v134_v58 }
  0x2a   :  { %v95_v63 = vrot.slane %v94_v56, 2  ;;  %v109_v0 = vrot.slane %v108_v57, 4  ;;  %v212_v35 = vrot.slane %v211_v21, 1  ;;  %v227_v36 = vadd.f32 %v226_v22, %v225_v14 }
  0x2b   :  { %v88_v3 = vadd.f32 %v87_v60, %v86_v52  ;;  %v102_v4 = vadd.f32 %v101_v61, %v100_v53  ;;  %v144_v38 = vadd.f32 %v143_v25, %v142_v51  ;;  %v152_v39 = vadd.f32 %v151_v28, %v150_v10 }
  0x2c   :  { %v96_v7 = vadd.f32 %v95_v63, %v94_v56  ;;  %v110_v8 = vadd.f32 %v109_v0, %v108_v57  ;;  %v129_v40 = vrot.slane %v128_v27, 1  ;;  %v205_v41 = vadd.f32 %v204_v30, %v203_v17 }
  0x2d   :  { %v89_v11 = vrot.slane %v88_v3, 1  ;;  %v103_v12 = vrot.slane %v102_v4, 2  ;;  %v220_v42 = vrot.slane %v219_v31, 1  ;;  %v137_v44 = vrot.slane %v136_v34, 1 }
  0x2e   :  { %v97_v15 = vrot.slane %v96_v7, 1  ;;  %v111_v16 = vrot.slane %v110_v8, 2  ;;  %v213_v45 = vadd.f32 %v212_v35, %v211_v21  ;;  %v228_v43 = vrot.slane %v227_v36, 1  ;;  %v266_v21 = vld [vmem:[#allocation2] sm:$0xf] }
  0x2f   :  { %v90_v19 = vadd.f32 %v89_v11, %v88_v3  ;;  %v104_v20 = vadd.f32 %v103_v12, %v102_v4  ;;  %v145_v46 = vrot.slane %v144_v38, 1  ;;  %v153_v47 = vrot.slane %v152_v39, 1 }
  0x30   :  { %v98_v23 = vadd.f32 %v97_v15, %v96_v7  ;;  %v112_v24 = vadd.f32 %v111_v16, %v110_v8  ;;  %v130_v48 = vadd.f32 %v129_v40, %v128_v27  ;;  %v221_v49 = vadd.f32 %v220_v42, %v219_v31 }
  0x31   :  { %v105_v26 = vrot.slane %v104_v20, 1  ;;  %349 = vlog2.f32 %v90_v19  ;;  %v230_v50 = vmul.f32 0.8909091, %v205_v41  ;;  %v138_v53 = vadd.f32 %v137_v44, %v136_v34 }
  0x32   :  { %v113_v29 = vrot.slane %v112_v24, 1  ;;  %351 = vlog2.f32 %v98_v23  ;;  %v229_v54 = vadd.f32 %v228_v43, %v227_v36  ;;  %v231_v55 = vmul.f32 0.8909091, %v213_v45 }
  0x33   :  { %v106_v33 = vadd.f32 %v105_v26, %v104_v20  ;;  %v146_v58 = vadd.f32 %v145_v46, %v144_v38  ;;  %v154_v60 = vadd.f32 %v153_v47, %v152_v39  ;;  %v232_v61 = vmul.f32 0.8909091, %v221_v49 }
  0x34   :  { %v114_v37 = vadd.f32 %v113_v29, %v112_v24  ;;  %v238_v62 = vmul.f32 0.009090909, %v130_v48  ;;  %v382_v63 = vmov 1983009808   ;;  %v233_v2 = vmul.f32 0.8909091, %v229_v54 }
  0x35   :  { %353 = vlog2.f32 %v106_v33  ;;  %v271_v0 = vunpack.c.l.s4 %v382_v63  ;;  %v239_v4 = vmul.f32 0.009090909, %v138_v53  ;;  %v240_v7 = vmul.f32 0.009090909, %v146_v58 }
  0x36   :  { %355 = vlog2.f32 %v114_v37  ;;  %v241_v9 = vmul.f32 0.009090909, %v154_v60 }
  0x37   :  { %v272_v12 = vunpack.c.0.s8 %v271_v0 }
  0x39   :  { %v275_v18 = vsub.s32 %v272_v12, %v427_v32 }
  0x3b   :  { %v350_v52 = vpop.eup %349 }
  0x3c   :  { %v352_v56 = vpop.eup %351  ;;  %v116_v57 = vmul.f32 0.6931472, %v350_v52 }
  0x3d   :  { %v118_v59 = vmul.f32 0.6931472, %v352_v56 }
  0x3e   :  { %v234_v51 = vsub.f32 %v116_v57, %v230_v50 }
  0x3f   :  { %v354_v1 = vpop.eup %353  ;;  %v235_v3 = vsub.f32 %v118_v59, %v231_v55 }
  0x40   :  { %v356_v5 = vpop.eup %355  ;;  %v120_v6 = vmul.f32 0.6931472, %v354_v1  ;;  %v242_v11 = vsub.f32 %v234_v51, %v238_v62 }
  0x41   :  { %v122_v8 = vmul.f32 0.6931472, %v356_v5  ;;  %v243_v14 = vsub.f32 %v235_v3, %v239_v4 }
  0x42   :  { %v236_v10 = vsub.f32 %v120_v6, %v232_v61 }
  0x43   :  { %v237_v13 = vsub.f32 %v122_v8, %v233_v2 }
  0x44   :  { %v244_v15 = vsub.f32 %v236_v10, %v240_v7 }
  0x45   :  { %v245_v16 = vsub.f32 %v237_v13, %v241_v9 }
  0x46   :  { %v260_v17 = vsel %vm259_vm9, %v244_v15, %v242_v11 }
  0x47   :  { %v261_v19 = vsel %vm259_vm9, %v245_v16, %v243_v14 }
  0x48   :  { %v269_v20 = vcombine.low %v260_v17, %v261_v19 }
  0x4a   :  { %v276_v22 = vrot.slane %v269_v20, %v275_v18 }
  0x4c   :  { %v278_v23 = vadd.f32 %v276_v22, %v266_v21 }
  0x4e   :  { %279 = vst [vmem:[#allocation2] sm:$0xf] %v278_v23 }
  0x55   :  { %v327_v24 = vld.sshfl [vmem:[#allocation2] sm:$0x33 pattern:$0x76325410] }
  0x56   :  { %v292_v25 = vcombine.high %v327_v24, %v327_v24  ;;  %v296_v26 = vsel %vm295_vm10, %v327_v24, 0.0 }
  0x58   :  { %v297_v27 = vsel %vm295_vm10, %v292_v25, 0.0 }
  0x59   :  { %v298_v28 = vadd.f32 %v297_v27, %v296_v26 }
  0x5b   :  { %299 = vadd.xlane.f32.xlu0 %v298_v28 }
  0xe8   :  { %v300_v29 = vpop.xlane.xlu0 %299 }
  0xe9   :  { %v301_v30 = vrot.slane %v300_v29, 4 }
  0xeb   :  { %v302_v31 = vadd.f32 %v301_v30, %v300_v29 }
  0xed   :  { %v303_v33 = vrot.slane %v302_v31, 2 }
  0xef   :  { %v304_v34 = vadd.f32 %v303_v33, %v302_v31 }
  0xf1   :  { %v305_v35 = vrot.slane %v304_v34, 1 }
  0xf3   :  { %v306_v32 = vadd.f32 %v305_v35, %v304_v34 }
  0xf5   :  { %328 = vpush %v306_v32 }
 0x126   :  { %s329_s27 = spop %328 }
 0x127   :  { %s308_s28 = smul.f32 0.001953125, %s329_s27 }
 0x129   :  { %v309_v36 = vstv %s308_s28 }
 0x12a   :  { %311 = vst.msk [vmem:[#allocation3] sm:$0x1] %vm310_vm11, %v309_v36 }
 0x12b   :  { %368 = shalt.err (!%p365_p4)
}
 0x12c   :  { %s369_s5 = scalar_lea.hbm %s472_s2, 16 }
 0x12d   :  { %p370_p5 = scmp.ne.s32.totalorder %s472_s2, %s369_s5  ;;  %p373_p6 = scmp.lt.u32.totalorder %s369_s5, %s472_s2 }
 0x12f   :  { %p375_p7 = pnand %p373_p6, %p370_p5 }
 0x131   :  { %378 = shalt.err (!%p375_p7)
}
 0x132   :  { %321 = dma.vmem_to_hbm [thread:$0]  %s319_s26, 16, %s472_s2, [#allocation4]  }
 0x133   :  { %379 = dma.done.wait [#allocation4], 16  }
 0x134   :  { %380 = vsyncadd [#allocation4], 4294967280 }
 0x135   :  { %325 = vsyncpa [#allocation4], 1 }

</bundles_post_ra>
